<compile_context>
chip_gen: v5e
topology: v5e:2x2
jax: 0.10.0
libtpu: 0.0.40
codegen_flags: <defaults>
</compile_context>

<pallas_src>
import jax
import jax.numpy as jnp
from jax.experimental import pallas as pl
from jax.experimental.pallas import tpu as pltpu


def linearnet_kernel(x_ref, w1_ref, b1_ref, w2_ref, b2_ref, o_ref):
    # x tile: (TB, IN_P) bf16; weights bf16 (resident); biases f32.
    x = x_ref[...]
    h = jnp.dot(x, w1_ref[...], preferred_element_type=jnp.float32) + b1_ref[...]
    # F.leaky_relu (negative_slope=0.01): one VPU max instead of compare+select.
    h = jnp.maximum(h, 0.01 * h)
    y = jnp.dot(h.astype(jnp.bfloat16), w2_ref[...],
                preferred_element_type=jnp.float32) + b2_ref[...]
    # F.sigmoid: exp on the EUP, reciprocal on the EUP too (approx) to stay off the VALU.
    o_ref[...] = pl.reciprocal(1.0 + jnp.exp(-y), approx=True).astype(o_ref.dtype)


def _round_up(n, m):
    return ((n + m - 1) // m) * m


def _pad2d(a, rows, cols):
    r, c = a.shape
    return jnp.pad(a, ((0, rows - r), (0, cols - c)))


def linearnet_forward(x, w1, b1, w2, b2, *, tb=None):
    """x: [B, in]; w1: [in, hidden]; b1: [1, hidden]; w2: [hidden, out]; b2: [1, out]."""
    B, in_f = x.shape
    h_f = w1.shape[1]
    out_f = w2.shape[1]

    # Lane-dense padded feature dims (multiples of 128).
    IN_P = _round_up(in_f, 128)
    H_P = _round_up(h_f, 128)
    OUT_P = _round_up(out_f, 128)

    # Batch tile: multiple of 16 (bf16 sublane packing for x, f32 sublanes for out).
    if tb is None:
        tb = min(512, _round_up(B, 16))
    tb = _round_up(tb, 16)
    B_P = _round_up(B, tb)
    grid = (B_P // tb,)

    # Pad & cast in the wrapper: bf16 matmul operands halve HBM traffic; biases stay f32.
    x_p = _pad2d(x.astype(jnp.float32), B_P, IN_P).astype(jnp.bfloat16)
    w1_p = _pad2d(w1.astype(jnp.float32), IN_P, H_P).astype(jnp.bfloat16)
    b1_p = _pad2d(b1.reshape(1, -1).astype(jnp.float32), 1, H_P)
    w2_p = _pad2d(w2.astype(jnp.float32), H_P, OUT_P).astype(jnp.bfloat16)
    b2_p = _pad2d(b2.reshape(1, -1).astype(jnp.float32), 1, OUT_P)

    # VMEM budget: double-buffered x/out tiles + resident weights/biases (+ headroom),
    # clamped to 32 MiB so it is safe on v7x's smaller (64 MiB physical) VMEM.
    vmem_bytes = (2 * tb * IN_P * 2 + 2 * tb * OUT_P * 4          # x/out double buffers
                  + IN_P * H_P * 2 + H_P * OUT_P * 2              # resident bf16 weights
                  + H_P * 4 + OUT_P * 4)                          # resident f32 biases
    vmem_limit = int(min(max(4 * vmem_bytes, 4 << 20), 32 << 20))

    cost = pl.CostEstimate(
        flops=int(2 * B_P * (IN_P * H_P + H_P * OUT_P)),
        transcendentals=int(B_P * OUT_P),
        bytes_accessed=int(x_p.size * 2 + w1_p.size * 2 + w2_p.size * 2
                           + b1_p.size * 4 + b2_p.size * 4 + B_P * OUT_P * 4),
    )

    out_p = pl.pallas_call(
        linearnet_kernel,
        out_shape=jax.ShapeDtypeStruct((B_P, OUT_P), jnp.float32),
        grid=grid,
        in_specs=[
            pl.BlockSpec((tb, IN_P), lambda i: (i, 0)),      # x tile, pipelined over batch
            pl.BlockSpec((IN_P, H_P), lambda i: (0, 0)),     # w1 resident
            pl.BlockSpec((1, H_P), lambda i: (0, 0)),        # b1 resident
            pl.BlockSpec((H_P, OUT_P), lambda i: (0, 0)),    # w2 resident
            pl.BlockSpec((1, OUT_P), lambda i: (0, 0)),      # b2 resident
        ],
        out_specs=pl.BlockSpec((tb, OUT_P), lambda i: (i, 0)),
        compiler_params=pltpu.CompilerParams(
            dimension_semantics=("parallel",),               # shards across v7x's 2 TCs
            vmem_limit_bytes=vmem_limit,
        ),
        cost_estimate=cost,
    )(x_p, w1_p, b1_p, w2_p, b2_p)

    # Padded sigmoid lanes are 0.5, padded rows are garbage -> slice both off.
    return out_p[:B, :out_f]


def init_params(key, input_size, hidden_size, output_size):
    # PyTorch-style uniform(-1/sqrt(fan_in), 1/sqrt(fan_in)) init, weights stored [in, out].
    k1, k2, k3, k4 = jax.random.split(key, 4)
    lim1 = 1.0 / jnp.sqrt(jnp.float32(input_size))
    lim2 = 1.0 / jnp.sqrt(jnp.float32(hidden_size))
    w1 = jax.random.uniform(k1, (input_size, hidden_size), jnp.float32, -lim1, lim1)
    b1 = jax.random.uniform(k2, (1, hidden_size), jnp.float32, -lim1, lim1)
    w2 = jax.random.uniform(k3, (hidden_size, output_size), jnp.float32, -lim2, lim2)
    b2 = jax.random.uniform(k4, (1, output_size), jnp.float32, -lim2, lim2)
    return w1, b1, w2, b2


if __name__ == "__main__":
    # Small shapes consistent with the module (x: [batch, input_size]); hidden scaled down.
    batch = 48          # deliberately not a tile multiple: exercises batch padding
    input_size = 50
    hidden_size = 256   # scaled down from 1024, kept a multiple of 128
    output_size = input_size

    key = jax.random.PRNGKey(0)
    kx, kp = jax.random.split(key)
    x = jax.random.normal(kx, (batch, input_size), dtype=jnp.float32)
    w1, b1, w2, b2 = init_params(kp, input_size, hidden_size, output_size)

    out = linearnet_forward(x, w1, b1, w2, b2, tb=32)   # grid=(2,)
    jax.block_until_ready(out)
    assert out.shape == (batch, output_size)

    # Reference 1: same math as the kernel (bf16 matmul operands, f32 accumulation).
    xb = x.astype(jnp.bfloat16)
    h_ref = jnp.dot(xb, w1.astype(jnp.bfloat16), preferred_element_type=jnp.float32) + b1
    h_ref = jnp.maximum(h_ref, 0.01 * h_ref)
    y_ref = jnp.dot(h_ref.astype(jnp.bfloat16), w2.astype(jnp.bfloat16),
                    preferred_element_type=jnp.float32) + b2
    ref_bf16 = jax.nn.sigmoid(y_ref)
    assert jnp.allclose(out, ref_bf16, atol=5e-3, rtol=0), "mismatch vs bf16-matched ref"

    # Reference 2: full-f32 torch semantics (looser tolerance due to bf16 matmuls).
    h32 = x @ w1 + b1
    h32 = jnp.where(h32 > 0, h32, 0.01 * h32)
    ref_f32 = jax.nn.sigmoid(h32 @ w2 + b2)
    assert jnp.allclose(out, ref_f32, atol=3e-2, rtol=0), "mismatch vs f32 ref"

    print("KERNEL_OK")
</pallas_src>

<mosaic_0001>
module attributes {stable_mosaic.version = 11 : i64} {
  func.func @linearnet_kernel(%arg0: i32, %arg1: memref<32x128xbf16, #tpu.memory_space<vmem>>, %arg2: memref<128x256xbf16, #tpu.memory_space<vmem>>, %arg3: memref<1x256xf32, #tpu.memory_space<vmem>>, %arg4: memref<256x128xbf16, #tpu.memory_space<vmem>>, %arg5: memref<1x128xf32, #tpu.memory_space<vmem>>, %arg6: memref<32x128xf32, #tpu.memory_space<vmem>>) attributes {dimension_semantics = [#tpu.dimension_semantics<parallel>], iteration_bounds = array<i64: 2>, scalar_prefetch = 0 : i64, scratch_operands = 0 : i64, tpu.core_type = #tpu.core_type<tc>, window_params = [{transform_indices = @transform_0, window_bounds = array<i64: 32, 128>}, {pipeline_mode = #tpu.pipeline_mode<synchronous>, transform_indices = @transform_1, window_bounds = array<i64: 128, 256>}, {pipeline_mode = #tpu.pipeline_mode<synchronous>, transform_indices = @transform_2, window_bounds = array<i64: 1, 256>}, {pipeline_mode = #tpu.pipeline_mode<synchronous>, transform_indices = @transform_3, window_bounds = array<i64: 256, 128>}, {pipeline_mode = #tpu.pipeline_mode<synchronous>, transform_indices = @transform_4, window_bounds = array<i64: 1, 128>}, {transform_indices = @transform_5, window_bounds = array<i64: 32, 128>}]} {
    %c0 = arith.constant 0 : index
    %c0_0 = arith.constant 0 : index
    %0 = vector.load %arg1[%c0, %c0_0] : memref<32x128xbf16, #tpu.memory_space<vmem>>, vector<32x128xbf16>
    %c0_1 = arith.constant 0 : index
    %c0_2 = arith.constant 0 : index
    %1 = vector.load %arg2[%c0_1, %c0_2] : memref<128x256xbf16, #tpu.memory_space<vmem>>, vector<128x256xbf16>
    %cst = arith.constant dense<0.000000e+00> : vector<32x256xf32>
    %2 = tpu.matmul %0, %1, %cst {dimension_numbers = #tpu.dot_dimension_numbers<[1], [0], [0], [1], [0, 0, 1, 1], [], []>} : vector<32x128xbf16>, vector<128x256xbf16>, vector<32x256xf32> -> vector<32x256xf32>
    %c0_3 = arith.constant 0 : index
    %c0_4 = arith.constant 0 : index
    %3 = vector.load %arg3[%c0_3, %c0_4] : memref<1x256xf32, #tpu.memory_space<vmem>>, vector<1x256xf32>
    %4 = vector.broadcast %3 : vector<1x256xf32> to vector<32x256xf32>
    %5 = arith.addf %2, %4 : vector<32x256xf32>
    %cst_5 = arith.constant 0.00999999977 : f32
    %6 = vector.broadcast %cst_5 : f32 to vector<32x256xf32>
    %7 = arith.mulf %6, %5 : vector<32x256xf32>
    %8 = arith.maximumf %5, %7 : vector<32x256xf32>
    %9 = arith.truncf %8 : vector<32x256xf32> to vector<32x256xbf16>
    %c0_6 = arith.constant 0 : index
    %c0_7 = arith.constant 0 : index
    %10 = vector.load %arg4[%c0_6, %c0_7] : memref<256x128xbf16, #tpu.memory_space<vmem>>, vector<256x128xbf16>
    %cst_8 = arith.constant dense<0.000000e+00> : vector<32x128xf32>
    %11 = tpu.matmul %9, %10, %cst_8 {dimension_numbers = #tpu.dot_dimension_numbers<[1], [0], [0], [1], [0, 0, 1, 1], [], []>} : vector<32x256xbf16>, vector<256x128xbf16>, vector<32x128xf32> -> vector<32x128xf32>
    %c0_9 = arith.constant 0 : index
    %c0_10 = arith.constant 0 : index
    %12 = vector.load %arg5[%c0_9, %c0_10] : memref<1x128xf32, #tpu.memory_space<vmem>>, vector<1x128xf32>
    %13 = vector.broadcast %12 : vector<1x128xf32> to vector<32x128xf32>
    %14 = arith.addf %11, %13 : vector<32x128xf32>
    %cst_11 = arith.constant 0.000000e+00 : f32
    %15 = vector.broadcast %cst_11 : f32 to vector<32x128xf32>
    %16 = arith.subf %15, %14 : vector<32x128xf32>
    %17 = math.exp %16 : vector<32x128xf32>
    %cst_12 = arith.constant 1.000000e+00 : f32
    %18 = vector.broadcast %cst_12 : f32 to vector<32x128xf32>
    %19 = arith.addf %18, %17 : vector<32x128xf32>
    %20 = tpu.reciprocal %19 {approx = true} : vector<32x128xf32> -> vector<32x128xf32>
    %c0_13 = arith.constant 0 : index
    %c0_14 = arith.constant 0 : index
    %21 = vector.load %arg6[%c0_13, %c0_14] : memref<32x128xf32, #tpu.memory_space<vmem>>, vector<32x128xf32>
    tpu.vector_store %arg6[%c0_13, %c0_14], %20 {strides = array<i32>} : memref<32x128xf32, #tpu.memory_space<vmem>>, vector<32x128xf32>,
    return
  }
  func.func @transform_0(%arg0: i32) -> (i32, i32) {
    %c0_i32 = arith.constant 0 : i32
    %c0_i32_0 = arith.constant 0 : i32
    return %arg0, %c0_i32 : i32, i32
  }
  func.func @transform_1(%arg0: i32) -> (i32, i32) {
    %c0_i32 = arith.constant 0 : i32
    %c0_i32_0 = arith.constant 0 : i32
    %c0_i32_1 = arith.constant 0 : i32
    return %c0_i32, %c0_i32_0 : i32, i32
  }
  func.func @transform_2(%arg0: i32) -> (i32, i32) {
    %c0_i32 = arith.constant 0 : i32
    %c0_i32_0 = arith.constant 0 : i32
    %c0_i32_1 = arith.constant 0 : i32
    return %c0_i32, %c0_i32_0 : i32, i32
  }
  func.func @transform_3(%arg0: i32) -> (i32, i32) {
    %c0_i32 = arith.constant 0 : i32
    %c0_i32_0 = arith.constant 0 : i32
    %c0_i32_1 = arith.constant 0 : i32
    return %c0_i32, %c0_i32_0 : i32, i32
  }
  func.func @transform_4(%arg0: i32) -> (i32, i32) {
    %c0_i32 = arith.constant 0 : i32
    %c0_i32_0 = arith.constant 0 : i32
    %c0_i32_1 = arith.constant 0 : i32
    return %c0_i32, %c0_i32_0 : i32, i32
  }
  func.func @transform_5(%arg0: i32) -> (i32, i32) {
    %c0_i32 = arith.constant 0 : i32
    %c0_i32_0 = arith.constant 0 : i32
    return %arg0, %c0_i32 : i32, i32
  }
}

</mosaic_0001>

<bundles_post_ra>
// kernel: tpu_custom_call.1
= control target key start
LH: loop header
LB: loop body
LE: loop exit
PB: predicated region body
PF: predicated region fallthrough
CT: control target
= control target key end

     0   :  { %10 = vsyncpa [#allocation3], 0  ;;  %s1482_s0 = inlined_call_operand.hbm [shape: bf16[64,128], index: 0, kind: input, shape index: {}]   ;;  %s1483_s1 = inlined_call_operand.hbm [shape: bf16[128,256], index: 1, kind: input, shape index: {}]   ;;  %s1484_s2 = inlined_call_operand.hbm [shape: f32[1,256], index: 2, kind: input, shape index: {}]   ;;  %s1485_s3 = inlined_call_operand.hbm [shape: bf16[256,128], index: 3, kind: input, shape index: {}]   ;;  %s1486_s4 = inlined_call_operand.vmem [shape: f32[1,128], index: 4, kind: input, shape index: {}]   ;;  %s1487_s5 = inlined_call_operand.hbm [shape: f32[64,128], index: 5, kind: output, shape index: {}]  }
   0x1   :  { %12 = vsyncpa [#allocation3 + $0x1], 0 }
   0x2   :  { %13 = vsyncpa [#allocation6], 0 }
   0x3   :  { %14 = vsyncpa [#allocation9], 0 }
   0x4   :  { %15 = vsyncpa [#allocation4], 0 }
   0x5   :  { %17 = vsyncpa [#allocation4 + $0x1], 0  ;;  %s1310_s18 = smov 0   ;;  %s1312_s19 = smov 0  }
   0x6   :  { %s1314_s20 = smov 0   ;;  %s1316_s21 = smov 0  }
   0x7 LB: > { %s1331_s22 = sadd.s32 4294967295, %s1269_s21   ;;  %s783_s23 = sadd.s32 4294967294, %s1269_s21   ;;  %s1269_s21 = sphi %s1316_s21, %s1500_s21   ;;  %s1265_s20 = sphi %s1314_s20, %s1499_s20   ;;  %s1261_s19 = sphi %s1312_s19, %s1498_s19   ;;  %s1257_s18 = sphi %s1310_s18, %s1497_s18  }
   0x8   : > { %p43_p0 = scmp.ne.s32.totalorder %s1261_s19, %s1257_s18  ;;  %p44_p1 = scmp.eq.s32.totalorder %s1331_s22, 0 }
   0x9   : > { %p151_p2 = scmp.eq.s32.totalorder %s1331_s22, 1  ;;  %p157_p3 = scmp.eq.s32.totalorder %s783_s23, 1 }
   0xa   : > { %p1340_p4 = por %p44_p1, %p43_p0  ;;  %p784_p5 = scmp.ge.s32.totalorder %s1269_s21, 1 }
   0xb   : > { %p1345_p6 = por %p157_p3, %p43_p0  ;;  %p164_p7 = scmp.lt.s32.totalorder %s1269_s21, 3 }
   0xc   : > { %s175_s28 = sshll.u32 %s1483_s1, 4  ;;  %s1271_s30 = smov [#allocation5]   ;;  %s176_s28 = int_to_ptr.hbm [resolvable:$true] %s175_s28 }
   0xd   : > { %p1353_p8 = pnand %p784_p5, %p164_p7  ;;  %s177_s6 = sshll.u32 %s1271_s30, 4  ;;  %s178_s6 = int_to_ptr.vmem [resolvable:$true] %s177_s6 }
   0xe   : > { %s190_s10 = sshll.u32 %s1484_s2, 4  ;;  %s1272_s11 = smov 128   ;;  %s191_s10 = int_to_ptr.hbm [resolvable:$true] %s190_s10 }
   0xf   : > { %p991_p9 = pneg %p1353_p8  ;;  %s1273_s12 = smov 8  }
  0x10   : > { %s1274_s13 = smov [#allocation7]   ;;  %s201_s17 = sshll.u32 %s1485_s3, 4  ;;  %s202_s17 = int_to_ptr.hbm [resolvable:$true] %s201_s17 }
  0x11   : > { %p1361_p10 = pnand %p991_p9, %p44_p1  ;;  %s192_s14 = sshll.u32 %s1274_s13, 4  ;;  %s193_s14 = int_to_ptr.vmem [resolvable:$true] %s192_s14 }
  0x12   : > { %s1275_s23 = smov [#allocation8]   ;;  %s1488_s27 = smov 64  }
  0x13   : > { %994 = dma.hbm_to_vmem [thread:$0]  (!%p1361_p10), %s176_s28, 2048, %s178_s6, [#allocation6], %s1272_s11, %s1272_s11, %s1273_s12  }
  0x14   : > { %997 = dma.hbm_to_vmem [thread:$0]  (!%p1361_p10), %s191_s10, 32, %s193_s14, [#allocation6]  }
  0x15   : > { %s203_s26 = sshll.u32 %s1275_s23, 4  ;;  %s1277_s28 = smov 4   ;;  %s204_s26 = int_to_ptr.vmem [resolvable:$true] %s203_s26 }
  0x16   : > { %1000 = dma.hbm_to_vmem [thread:$0]  (!%p1361_p10), %s202_s17, 2048, %s204_s26, [#allocation9], %s1488_s27, %s1488_s27, %s1277_s28  }
  0x17   : > { %s1382_s30 = sadd.s32 1, %s1269_s21   ;;  %s30_s8 = sadd.s32 1, %s1265_s20 }
  0x18   : > { %s27_s6 = ssub.s32 %s1269_s21, %s1382_s30  ;;  %p37_p13 = scmp.ne.s32.totalorder %s1265_s20, %s1261_s19 }
  0x19   : > { %p28_p12 = scmp.eq.s32.totalorder %s27_s6, 0  ;;  %p38_p0 = scmp.eq.s32.totalorder %s1269_s21, 0 }
  0x1a   : > { %p1395_p3 = por %p151_p2, %p37_p13  ;;  %p1012_p5 = scmp.lt.s32.totalorder %s1269_s21, 2 }
  0x1b   : > { %s1391_s9 = scalar_select %p28_p12, %s1265_s20, %s30_s8  }
  0x1c   : > { %s220_s7 = sand.u32 1, %s1265_s20   ;;  %s939_s11 = sshll.u32 %s1269_s21, 4 }
  0x1d   : > { %p39_p7 = por %p38_p0, %p37_p13  ;;  %s789_s12 = sshll.u32 %s220_s7, 4 }
  0x1e   : > { %s229_s15 = scalar_lea.hbm %s1482_s0, %s939_s11  ;;  %s224_s17 = scalar_lea.vmem [#allocation2], %s789_s12 }
  0x1f   : > { %s230_s16 = sshll.u32 %s229_s15, 4  ;;  %s232_s23 = sshll.u32 %s224_s17, 4  ;;  %s231_s16 = int_to_ptr.hbm [resolvable:$true] %s230_s16  ;;  %s233_s23 = int_to_ptr.vmem [resolvable:$true] %s232_s23 }
  0x20   : > { %p1405_p9 = pnand %p1012_p5, %p39_p7  ;;  %s221_s6 = scalar_lea.sflag [#allocation3], %s220_s7 }
  0x21   : > { %s1165_s8 = sshra.s32 %s231_s16, 4  ;;  %s1172_s12 = scalar_lea.hbm %s1482_s0, 32  ;;  %s1166_s8 = int_to_ptr.hbm [resolvable:$true] %s1165_s8 }
  0x22   : > { %s1167_s27 = scalar_lea.hbm %s1166_s8, 16  ;;  %p1169_p10 = pneg %p1405_p9 }
  0x23   : > { %p1168_p2 = scmp.ne.s32.totalorder %s1166_s8, %s1167_s27  ;;  %p1173_p0 = scmp.lt.s32.totalorder %s1166_s8, %s1482_s0 }
  0x24   : > { %p1174_p5 = scmp.lt.s32.totalorder %s1172_s12, %s1167_s27 }
  0x25   : > { %p1170_p12 = pnand %p1169_p10, %p1168_p2 }
  0x26   : > { %p1175_p7 = por %p1174_p5, %p1173_p0 }
  0x27   : > { %p1171_p13 = pneg %p1170_p12 }
  0x29   : > { %p1176_p11 = pnand %p1175_p7, %p1171_p13 }
  0x2b   : > { %1179 = shalt.err (!%p1176_p11)
}
  0x2c   : > { %s1495_s7 = smov 64   ;;  %244 = sbr.rel (%p1353_p8) target bundleno = 414 (0x19e), region = 40 }
  0x2d   : > { %1004 = dma.hbm_to_vmem [thread:$0]  (!%p1405_p9), %s231_s16, 256, %s233_s23, %s221_s6, %s1495_s7, %s1495_s7, %s1277_s28  }
  0x2e   : > { %s1425_s17 = sand.u32 (!%p1353_p8), 1, %s1261_s19  }
  0x2f   : > { %s793_s8 = sshll.u32 (!%p1353_p8), %s1425_s17, 4  ;;  %s247_s27 = scalar_lea.sflag (!%p1353_p8), [#allocation3], %s1425_s17 }
  0x30   : > { %s1429_s11 = scalar_lea.vmem (!%p1353_p8), [#allocation2], %s793_s8 }
  0x31   : > { %1240 = dma.done.wait (%p1340_p4), %s247_s27, 256  }
  0x32   : > { %1242 = vsyncadd (%p1340_p4), %s247_s27, 4294967040 }
  0x33   : > { %1244 = dma.done.wait (%p44_p1), [#allocation6], 2080  }
  0x34   : > { %1246 = vsyncadd (%p44_p1), [#allocation6], 4294965216 }
  0x35   : > { %1248 = dma.done.wait (%p44_p1), [#allocation9], 2048  }
  0x36   : > { %1250 = vsyncadd (%p44_p1), [#allocation9], 4294965248  ;;  %v864_v0 = vld [vmem:[#allocation5 + $0x70] sm:$0xf]  ;;  %v957_v1 = vld [vmem:[#allocation5 + $0x74] sm:$0xf0] }
  0x37   : > { %v956_v2 = vld [vmem:[#allocation5 + $0x74] sm:$0xf]  ;;  %v865_v3 = vor.u32 %v957_v1, %v864_v0  ;;  %v866_v4 = vld [vmem:[#allocation5 + $0x78] sm:$0xf0]  ;;  %v856_v5 = vld [vmem:[#allocation5 + $0x60] sm:$0xf] }
  0x38   : > { %v955_v6 = vld [vmem:[#allocation5 + $0x64] sm:$0xf0]  ;;  %v869_v7 = vor.u32 %v956_v2, %v866_v4  ;;  %v954_v8 = vld [vmem:[#allocation5 + $0x64] sm:$0xf]  ;;  %v858_v9 = vld [vmem:[#allocation5 + $0x68] sm:$0xf0] }
  0x39   : > { %413 = vmatpush.bf16.msra.mxu0 %v865_v3  ;;  %v857_v10 = vor.u32 %v955_v6, %v856_v5  ;;  %v861_v11 = vor.u32 %v954_v8, %v858_v9  ;;  %v848_v12 = vld [vmem:[#allocation5 + $0x50] sm:$0xf]  ;;  %v953_v13 = vld [vmem:[#allocation5 + $0x54] sm:$0xf0]  ;;  %v952_v14 = vld [vmem:[#allocation5 + $0x54] sm:$0xf] }
  0x3a   : > { %432 = vmatpush.bf16.msra.mxu1 %v869_v7  ;;  %v850_v15 = vld [vmem:[#allocation5 + $0x58] sm:$0xf0]  ;;  %v849_v16 = vor.u32 %v953_v13, %v848_v12  ;;  %v840_v18 = vld [vmem:[#allocation5 + $0x40] sm:$0xf]  ;;  %v951_v19 = vld [vmem:[#allocation5 + $0x44] sm:$0xf0] }
  0x3b   : > { %v853_v17 = vor.u32 %v952_v14, %v850_v15  ;;  %v950_v20 = vld [vmem:[#allocation5 + $0x44] sm:$0xf]  ;;  %v842_v21 = vld [vmem:[#allocation5 + $0x48] sm:$0xf0]  ;;  %v841_v22 = vor.u32 %v951_v19, %v840_v18  ;;  %v832_v24 = vld [vmem:[#allocation5 + $0x30] sm:$0xf] }
  0x3c   : > { %v845_v23 = vor.u32 %v950_v20, %v842_v21  ;;  %v949_v25 = vld [vmem:[#allocation5 + $0x34] sm:$0xf0]  ;;  %v948_v26 = vld [vmem:[#allocation5 + $0x34] sm:$0xf]  ;;  %v834_v27 = vld [vmem:[#allocation5 + $0x38] sm:$0xf0] }
  0x3d   : > { %414 = vmatpush.bf16.msra.mxu0 %v857_v10  ;;  %v833_v28 = vor.u32 %v949_v25, %v832_v24  ;;  %v837_v29 = vor.u32 %v948_v26, %v834_v27  ;;  %v824_v30 = vld [vmem:[#allocation5 + $0x20] sm:$0xf]  ;;  %v947_v31 = vld [vmem:[#allocation5 + $0x24] sm:$0xf0]  ;;  %v946_v32 = vld [vmem:[#allocation5 + $0x24] sm:$0xf] }
  0x3e   : > { %433 = vmatpush.bf16.msra.mxu1 %v861_v11  ;;  %v826_v33 = vld [vmem:[#allocation5 + $0x28] sm:$0xf0]  ;;  %v825_v34 = vor.u32 %v947_v31, %v824_v30  ;;  %v965_v35 = vld [vmem:[#allocation8 + $0x38] sm:$0xff]  ;;  %v816_v38 = vld [vmem:[#allocation5 + $0x10] sm:$0xf]  ;;  %s797_s28 = sshll.u32 %s1425_s17, 5 }
  0x3f   : > { %v973_v36 = vld [vmem:[#allocation8 + $0x78] sm:$0xff]  ;;  %v829_v37 = vor.u32 %v946_v32, %v826_v33  ;;  %v944_v40 = vld [vmem:[#allocation5 + $0x14] sm:$0xf]  ;;  %603 = vmatpush.bf16.msra.mxu2 %v965_v35  ;;  %v943_v47 = vld [vmem:[#allocation5 + $0x4] sm:$0xf0]  ;;  %s292_s16 = scalar_lea.vmem [#allocation10], %s797_s28 }
  0x40   : > { %v945_v39 = vld [vmem:[#allocation5 + $0x14] sm:$0xf0]  ;;  %v818_v41 = vld [vmem:[#allocation5 + $0x18] sm:$0xf0]  ;;  %622 = vmatpush.bf16.msra.mxu3 %v973_v36  ;;  %v808_v46 = vld [vmem:[#allocation5] sm:$0xf] }
  0x41   : > { %415 = vmatpush.bf16.msra.mxu0 %v849_v16  ;;  %v964_v42 = vld [vmem:[#allocation8 + $0x30] sm:$0xff]  ;;  %v817_v44 = vor.u32 %v945_v39, %v816_v38  ;;  %v821_v45 = vor.u32 %v944_v40, %v818_v41  ;;  %v942_v48 = vld [vmem:[#allocation5 + $0x4] sm:$0xf]  ;;  %v810_v49 = vld [vmem:[#allocation5 + $0x8] sm:$0xf0]  ;;  %v809_v52 = vor.u32 %v943_v47, %v808_v46  ;;  %s974_s23 = sshll.u32 %s1331_s22, 5 }
  0x42   : > { %434 = vmatpush.bf16.msra.mxu1 %v853_v17  ;;  %v972_v43 = vld [vmem:[#allocation8 + $0x70] sm:$0xff]  ;;  %v963_v50 = vld [vmem:[#allocation8 + $0x28] sm:$0xff]  ;;  %v813_v53 = vor.u32 %v942_v48, %v810_v49  ;;  %v962_v54 = vld [vmem:[#allocation8 + $0x20] sm:$0xff]  ;;  %s677_s13 = scalar_lea.hbm %s1487_s5, %s974_s23  ;;  %s678_s12 = sshll.u32 %s292_s16, 4  ;;  %s679_s12 = int_to_ptr.vmem [resolvable:$true] %s678_s12 }
  0x43   : > { %604 = vmatpush.bf16.msra.mxu2 %v964_v42  ;;  %v971_v51 = vld [vmem:[#allocation8 + $0x68] sm:$0xff]  ;;  %v970_v55 = vld [vmem:[#allocation8 + $0x60] sm:$0xff]  ;;  %v961_v58 = vld [vmem:[#allocation8 + $0x18] sm:$0xff]  ;;  %s680_s14 = sshll.u32 %s677_s13, 4  ;;  %s666_s15 = scalar_lea.sflag [#allocation4], %s1425_s17  ;;  %s681_s14 = int_to_ptr.hbm [resolvable:$true] %s680_s14 }
  0x44   : > { %623 = vmatpush.bf16.msra.mxu3 %v972_v43  ;;  %v940_v56 = vld [vmem:[%s1429_s11] sm:$0xff]  ;;  %v941_v57 = vld [vmem:[%s1429_s11 + $0x8] sm:$0xff]  ;;  %s1209_s7 = sshra.s32 %s681_s14, 4  ;;  %s1215_s11 = scalar_lea.hbm %s1487_s5, 64  ;;  %s1210_s7 = int_to_ptr.hbm [resolvable:$true] %s1209_s7 }
  0x45   : > { %416 = vmatpush.bf16.msra.mxu0 %v841_v22  ;;  %v969_v59 = vld [vmem:[#allocation8 + $0x58] sm:$0xff]  ;;  %v960_v60 = vld [vmem:[#allocation8 + $0x10] sm:$0xff]  ;;  %v959_v62 = vld [vmem:[#allocation8 + $0x8] sm:$0xff]  ;;  %s1211_s22 = scalar_lea.hbm %s1210_s7, 32  ;;  %p1216_p11 = scmp.lt.s32.totalorder %s1210_s7, %s1487_s5 }
  0x46   : > { %435 = vmatpush.bf16.msra.mxu1 %v845_v23  ;;  %v968_v61 = vld [vmem:[#allocation8 + $0x50] sm:$0xff]  ;;  %v967_v63 = vld [vmem:[#allocation8 + $0x48] sm:$0xff]  ;;  %v958_v0 = vld [vmem:[#allocation8] sm:$0xff]  ;;  %p1212_p1 = scmp.ne.s32.totalorder %s1210_s7, %s1211_s22  ;;  %p1217_p9 = scmp.lt.s32.totalorder %s1215_s11, %s1211_s22 }
  0x47   : > { %605 = vmatpush.bf16.msra.mxu2 %v963_v50  ;;  %v966_v1 = vld [vmem:[#allocation8 + $0x40] sm:$0xff]  ;;  %v315_v2 = vld [vmem:[#allocation7] sm:$0x3] }
  0x48   : > { %624 = vmatpush.bf16.msra.mxu3 %v971_v51  ;;  %v317_v4 = vperm.slane %v315_v2, 0  ;;  %v318_v6 = vperm.slane %v315_v2, 1  ;;  %v1058_v41 = vld [vmem:[%s1486_s4] ss:$0 sm:$0xff]  ;;  %p1213_p4 = pnand %p1212_p1, %p1395_p3  ;;  %p1218_p2 = por %p1217_p9, %p1216_p11 }
  0x49   : > { %417 = vmatpush.bf16.msra.mxu0 %v833_v28 }
  0x4a   : > { %436 = vmatpush.bf16.msra.mxu1 %v837_v29  ;;  %p1214_p8 = pneg %p1213_p4 }
  0x4b   : > { %606 = vmatpush.bf16.msra.mxu2 %v962_v54 }
  0x4c   : > { %625 = vmatpush.bf16.msra.mxu3 %v970_v55  ;;  %p1219_p10 = pnand %p1218_p2, %p1214_p8 }
  0x4d   : > { %418 = vmatpush.bf16.msra.mxu0 %v825_v34 }
  0x4e   : > { %437 = vmatpush.bf16.msra.mxu1 %v829_v37 }
  0x4f   : > { %607 = vmatpush.bf16.msra.mxu2 %v961_v58 }
  0x50   : > { %626 = vmatpush.bf16.msra.mxu3 %v969_v59 }
  0x51   : > { %419 = vmatpush.bf16.msra.mxu0 %v817_v44 }
  0x52   : > { %438 = vmatpush.bf16.msra.mxu1 %v821_v45 }
  0x53   : > { %608 = vmatpush.bf16.msra.mxu2 %v960_v60 }
  0x54   : > { %627 = vmatpush.bf16.msra.mxu3 %v968_v61 }
  0x55   : > { %420 = vmatpush.bf16.msra.mxu0 %v809_v52 }
  0x56   : > { %439 = vmatpush.bf16.msra.mxu1 %v813_v53 }
  0x57   : > { %609 = vmatpush.bf16.msra.mxu2 %v959_v62 }
  0x58   : > { %421 = vmatmul.bf16.vlgmr.msra.gmra.mxu0 %v940_v56  ;;  %628 = vmatpush.bf16.msra.mxu3 %v967_v63 }
  0x59   : > { %440 = vmatmul.bf16.vlgmr.msra.gmra.mxu1 %v940_v56 }
  0x5b   : > { %610 = vmatpush.bf16.msra.mxu2 %v958_v0 }
  0x5c   : > { %629 = vmatpush.bf16.msra.mxu3 %v966_v1 }
  0x68   : > { %426 = vmatmul.bf16.gmra.mxu0 %v941_v57 }
  0x69   : > { %445 = vmatmul.bf16.gmra.mxu1 %v941_v57 }
  0xd5   : > { %v422_v3 = vpop.f32.mrf.mxu0 }
  0xd6   : > { %v441_v5 = vpop.f32.mrf.mxu1  ;;  %v423_v7 = vadd.f32 %v422_v3, %v317_v4 }
  0xd7   : > { %v442_v8 = vadd.f32 %v441_v5, %v318_v6 }
  0xd8   : > { %v451_v10 = vmul.f32 0.01, %v423_v7 }
  0xd9   : > { %v452_v13 = vmul.f32 0.01, %v442_v8 }
  0xda   : > { %v459_v17 = vmax.f32 %v423_v7, %v451_v10 }
  0xdb   : > { %v460_v19 = vmax.f32 %v442_v8, %v452_v13 }
  0xdd   : > { %v424_v9 = vpop.f32.mrf.mxu0 }
  0xde   : > { %v425_v11 = vadd.f32 %v424_v9, %v317_v4  ;;  %v443_v12 = vpop.f32.mrf.mxu1 }
  0xdf   : > { %v444_v14 = vadd.f32 %v443_v12, %v318_v6 }
  0xe0   : > { %v453_v15 = vmul.f32 0.01, %v425_v11 }
  0xe1   : > { %v454_v16 = vmul.f32 0.01, %v444_v14 }
  0xe2   : > { %v461_v18 = vmax.f32 %v425_v11, %v453_v15 }
  0xe3   : > { %v462_v20 = vmax.f32 %v444_v14, %v454_v16 }
  0xe4   : > { %v467_v21 = vpack.c.bf16 %v461_v18, %v459_v17 }
  0xe5   : > { %v427_v22 = vpop.f32.mrf.mxu0  ;;  %v468_v23 = vpack.c.bf16 %v462_v20, %v460_v19 }
  0xe6   : > { %v446_v24 = vpop.f32.mrf.mxu1  ;;  %611 = vmatmul.bf16.vlgmr.msra.gmra.mxu2 %v467_v21  ;;  %v428_v25 = vadd.f32 %v427_v22, %v317_v4 }
  0xe7   : > { %630 = vmatmul.bf16.vlgmr.msra.gmra.mxu3 %v468_v23  ;;  %v447_v26 = vadd.f32 %v446_v24, %v318_v6 }
  0xe8   : > { %v455_v28 = vmul.f32 0.01, %v428_v25 }
  0xe9   : > { %v456_v31 = vmul.f32 0.01, %v447_v26 }
  0xea   : > { %v463_v35 = vmax.f32 %v428_v25, %v455_v28 }
  0xeb   : > { %v464_v37 = vmax.f32 %v447_v26, %v456_v31 }
  0xed   : > { %v429_v27 = vpop.f32.mrf.mxu0 }
  0xee   : > { %v430_v29 = vadd.f32 %v429_v27, %v317_v4  ;;  %v448_v30 = vpop.f32.mrf.mxu1 }
  0xef   : > { %v449_v32 = vadd.f32 %v448_v30, %v318_v6 }
  0xf0   : > { %v457_v33 = vmul.f32 0.01, %v430_v29 }
  0xf1   : > { %v458_v34 = vmul.f32 0.01, %v449_v32 }
  0xf2   : > { %v465_v36 = vmax.f32 %v430_v29, %v457_v33 }
  0xf3   : > { %v466_v38 = vmax.f32 %v449_v32, %v458_v34 }
  0xf4   : > { %v469_v39 = vpack.c.bf16 %v465_v36, %v463_v35 }
  0xf5   : > { %v470_v40 = vpack.c.bf16 %v466_v38, %v464_v37 }
  0xf6   : > { %616 = vmatmul.bf16.gmra.mxu2 %v469_v39 }
  0xf7   : > { %635 = vmatmul.bf16.gmra.mxu3 %v470_v40 }
 0x169   : > { %v612_v42 = vpop.f32.mrf.mxu2 }
 0x16a   : > { %v613_v43 = vadd.f32 %v1058_v41, %v612_v42  ;;  %v631_v44 = vpop.f32.mrf.mxu3 }
 0x16c   : > { %v632_v45 = vadd.f32 %v631_v44, %v613_v43 }
 0x16e   : > { %v641_v46 = vsub.f32 0.0, %v632_v45 }
 0x170   : > { %v645_v47 = vmul.f32 1.442695, %v641_v46 }
 0x171   : > { %v614_v48 = vpop.f32.mrf.mxu2 }
 0x172   : > { %1059 = vpow2.f32 %v645_v47  ;;  %v615_v49 = vadd.f32 %v1058_v41, %v614_v48  ;;  %v633_v50 = vpop.f32.mrf.mxu3 }
 0x174   : > { %v634_v51 = vadd.f32 %v633_v50, %v615_v49 }
 0x176   : > { %v642_v52 = vsub.f32 0.0, %v634_v51 }
 0x178   : > { %v1060_v53 = vpop.eup %1059  ;;  %v647_v54 = vmul.f32 1.442695, %v642_v52 }
 0x179   : > { %v653_v55 = vadd.f32 1.0, %v1060_v53  ;;  %v617_v56 = vpop.f32.mrf.mxu2 }
 0x17a   : > { %1061 = vpow2.f32 %v647_v54  ;;  %v618_v57 = vadd.f32 %v1058_v41, %v617_v56  ;;  %v636_v58 = vpop.f32.mrf.mxu3 }
 0x17b   : > { %1063 = vrcp.f32 %v653_v55 }
 0x17c   : > { %v637_v59 = vadd.f32 %v636_v58, %v618_v57 }
 0x17e   : > { %v643_v60 = vsub.f32 0.0, %v637_v59 }
 0x180   : > { %v1062_v61 = vpop.eup %1061  ;;  %v649_v62 = vmul.f32 1.442695, %v643_v60 }
 0x181   : > { %v1064_v63 = vpop.eup %1063  ;;  %v654_v0 = vadd.f32 1.0, %v1062_v61  ;;  %v619_v1 = vpop.f32.mrf.mxu2 }
 0x182   : > { %661 = vst [vmem:[%s292_s16] sm:$0xff] %v1064_v63  ;;  %1065 = vpow2.f32 %v649_v62  ;;  %v620_v2 = vadd.f32 %v1058_v41, %v619_v1  ;;  %v638_v3 = vpop.f32.mrf.mxu3 }
 0x183   : > { %1067 = vrcp.f32 %v654_v0 }
 0x184   : > { %v639_v4 = vadd.f32 %v638_v3, %v620_v2 }
 0x186   : > { %v644_v5 = vsub.f32 0.0, %v639_v4 }
 0x188   : > { %v1066_v6 = vpop.eup %1065  ;;  %v651_v7 = vmul.f32 1.442695, %v644_v5 }
 0x189   : > { %v1068_v8 = vpop.eup %1067  ;;  %v655_v9 = vadd.f32 1.0, %v1066_v6 }
 0x18a   : > { %662 = vst [vmem:[%s292_s16 + $0x8] sm:$0xff] %v1068_v8  ;;  %1069 = vpow2.f32 %v651_v7 }
 0x18b   : > { %1071 = vrcp.f32 %v655_v9 }
 0x190   : > { %v1070_v10 = vpop.eup %1069 }
 0x191   : > { %v1072_v11 = vpop.eup %1071  ;;  %v656_v12 = vadd.f32 1.0, %v1070_v10 }
 0x192   : > { %663 = vst [vmem:[%s292_s16 + $0x10] sm:$0xff] %v1072_v11 }
 0x193   : > { %1073 = vrcp.f32 %v656_v12 }
 0x199   : > { %v1074_v13 = vpop.eup %1073 }
 0x19a   : > { %664 = vst [vmem:[%s292_s16 + $0x18] sm:$0xff] %v1074_v13 }
 0x19b   : > { %1222 = shalt.err (!%p1219_p10)
}
 0x19c   : > { %s1278_s17 = smov 128   ;;  %s1279_s28 = smov 8  }
 0x19d   : > { %989 = dma.vmem_to_hbm [thread:$0]  (%p1395_p3), %s679_s12, 512, %s681_s14, %s666_s15, %s1278_s17, %s1278_s17, %s1279_s28  }
 0x19e PF: > { %s695_s16 = sand.u32 1, %s1257_s18   ;;  %p1496_p12 = scmp.ge.s32.totalorder %s1269_s21, 2 }
 0x19f   : > { %s696_s23 = scalar_lea.sflag [#allocation4], %s695_s16 }
 0x1a0   : > { %p1006_p13 = pnand %p1496_p12, %p1345_p6 }
 0x1a2   : > { %p1007_p0 = pneg %p1006_p13 }
 0x1a4   : > { %1252 = dma.done.wait (%p1007_p0), %s696_s23, 512  }
 0x1a5   : > { %1254 = vsyncadd (%p1007_p0), %s696_s23, 4294966784  ;;  %p20_p5 = scmp.ge.s32.totalorder %s1382_s30, 4   ;;  %s1497_s18 = smov %s1261_s19 }
 0x1a6   : > { %s1498_s19 = smov %s1265_s20  ;;  %s1499_s20 = smov %s1391_s9 }
 0x1a7   : > { %s1500_s21 = smov %s1382_s30  ;;  %22 = sbr.rel (!%p20_p5) target bundleno = 7 (0x7), region = 97 }
 0x1ac   :  { %702 = vsyncpa [#allocation3], 1 }
 0x1ad   :  { %704 = vsyncpa [#allocation3 + $0x1], 1 }
 0x1ae   :  { %705 = vsyncpa [#allocation6], 1 }
 0x1af   :  { %706 = vsyncpa [#allocation9], 1 }
 0x1b0   :  { %707 = vsyncpa [#allocation4], 1 }
 0x1b1   :  { %709 = vsyncpa [#allocation4 + $0x1], 1 }

</bundles_post_ra>
